<compile_context>
chip_gen: v5e
topology: v5e:2x2
jax: 0.10.0
libtpu: 0.0.40
codegen_flags: <defaults>
</compile_context>

<pallas_src>
import numpy as np
import jax
import jax.numpy as jnp
from jax import lax
from jax.experimental import pallas as pl
from jax.experimental.pallas import tpu as pltpu

LRELU_SLOPE = 0.1
PERIODS = (2, 3, 5, 7, 11)
LANE = 128


def get_padding(kernel_size, dilation=1):
    return int((kernel_size * dilation - dilation) / 2)


# (Cin, Cout, K, stride, pad) for the 5 convs + conv_post of DiscriminatorP
LAYER_SPECS = [
    (1, 32, 5, 3, get_padding(5, 1)),
    (32, 128, 5, 3, get_padding(5, 1)),
    (128, 512, 5, 3, get_padding(5, 1)),
    (512, 1024, 5, 3, get_padding(5, 1)),
    (1024, 1024, 5, 1, 2),
    (1024, 1, 3, 1, 1),      # conv_post
]


def _round_up(x, m):
    return (x + m - 1) // m * m


# ----------------------------- Pallas kernel --------------------------------

def _make_mm_bias_act_kernel(apply_lrelu):
    """Fused (M,Kd)@(Kd,Cout) + bias (+ leaky-relu) on one M tile."""
    def kernel(a_ref, w_ref, b_ref, o_ref):
        # a_ref: (TM, Kd) bf16, w_ref: (Kd, Coutp) bf16, b_ref: (1, Coutp) f32
        acc = jnp.dot(a_ref[...], w_ref[...],
                      preferred_element_type=jnp.float32)
        out = acc + b_ref[...]
        if apply_lrelu:
            out = jnp.where(out >= 0.0, out, LRELU_SLOPE * out)
        o_ref[...] = out.astype(o_ref.dtype)
    return kernel


def fused_matmul_bias_act(a, w, b, *, apply_lrelu, block_m=256):
    """a: (M, Kd) bf16, w: (Kd, Coutp) bf16, b: (1, Coutp) f32 -> (M, Coutp) f32."""
    M, Kd = a.shape
    Coutp = w.shape[1]
    tm = min(block_m, _round_up(M, 16))       # sublane/bf16-pack aligned tile
    Mp = _round_up(M, tm)
    if Mp != M:
        a = jnp.pad(a, ((0, Mp - M), (0, 0)))

    out = pl.pallas_call(
        _make_mm_bias_act_kernel(apply_lrelu),
        out_shape=jax.ShapeDtypeStruct((Mp, Coutp), jnp.float32),
        grid=(Mp // tm,),
        in_specs=[
            pl.BlockSpec((tm, Kd), lambda m: (m, 0)),        # activations tile
            pl.BlockSpec((Kd, Coutp), lambda m: (0, 0)),     # resident weight
            pl.BlockSpec((1, Coutp), lambda m: (0, 0)),      # resident bias
        ],
        out_specs=pl.BlockSpec((tm, Coutp), lambda m: (m, 0)),
        compiler_params=pltpu.CompilerParams(
            dimension_semantics=("parallel",),               # megacore on v7x
            vmem_limit_bytes=48 * 1024 * 1024,               # <= v7x 64 MiB VMEM
        ),
    )(a, w, b)
    return out[:M]


# ------------------------------ parameters ----------------------------------
# weight_norm at init makes the effective weight equal the raw weight
# (g = ||v||), so deterministic raw weights reproduce init-time semantics.

def init_disc_params(key):
    params = []
    for (cin, cout, k, _, _) in LAYER_SPECS:
        key, kw, kb = jax.random.split(key, 3)
        fan_in = cin * k
        bound = 1.0 / np.sqrt(fan_in)
        w = jax.random.uniform(kw, (k, cin, cout), jnp.float32, -bound, bound)
        b = jax.random.uniform(kb, (cout,), jnp.float32, -bound, bound)
        params.append((w, b))
    return params


# ----------------------------- forward passes -------------------------------

def _im2col(x, K, stride, pad):
    """x: (N, H, Cin) f32 -> (N*Hout, K*Cin) patches (zero-padded along H)."""
    N, H, Cin = x.shape
    Hp = H + 2 * pad
    Hout = (Hp - K) // stride + 1
    xp = jnp.pad(x, ((0, 0), (pad, pad), (0, 0)))
    taps = [lax.slice_in_dim(xp, k, k + (Hout - 1) * stride + 1,
                             stride=stride, axis=1)            # (N, Hout, Cin)
            for k in range(K)]
    patches = jnp.stack(taps, axis=2)                          # (N, Hout, K, Cin)
    return patches.reshape(N * Hout, K * Cin), Hout


def discriminator_p_forward(params, x, period):
    """x: (B, 1, T) -> (flattened logits (B, Hf*period), fmap list in NCHW)."""
    B, C, T = x.shape
    if T % period != 0:
        n_pad = period - T % period
        x = jnp.pad(x, ((0, 0), (0, 0), (0, n_pad)), mode="reflect")
        T = T + n_pad
    H = T // period
    N = B * period
    x4 = x.reshape(B, C, H, period)                                  # NCHW
    cur = jnp.transpose(x4, (0, 3, 2, 1)).reshape(N, H, C)           # (N, H, Cin)

    fmap = []
    for i, (w, b) in enumerate(params):
        cin, cout, K, stride, pad = LAYER_SPECS[i]
        A, Hout = _im2col(cur, K, stride, pad)                       # (N*Hout, K*Cin)
        A = A.astype(jnp.bfloat16)

        # pad Cout up to a lane multiple so stores are lane-dense
        Coutp = max(_round_up(cout, LANE), LANE)
        w2 = w.reshape(K * cin, cout)
        b2 = b
        if Coutp != cout:
            w2 = jnp.pad(w2, ((0, 0), (0, Coutp - cout)))
            b2 = jnp.pad(b, (0, Coutp - cout))
        w2 = w2.astype(jnp.bfloat16)
        b2 = b2.reshape(1, Coutp).astype(jnp.float32)

        last = (i == len(params) - 1)
        out = fused_matmul_bias_act(A, w2, b2, apply_lrelu=not last)  # (M, Coutp) f32
        out = out[:, :cout].reshape(N, Hout, cout)
        cur = out
        # fmap in torch NCHW layout (B, Cout, Hout, period)
        fmap.append(jnp.transpose(out.reshape(B, period, Hout, cout), (0, 3, 2, 1)))

    logits_nchw = fmap[-1]                     # (B, 1, Hf, period)
    return logits_nchw.reshape(B, -1), fmap    # torch.flatten(x, 1, -1) order


def multi_period_discriminator(all_params, y, y_hat):
    y_d_rs, y_d_gs, fmap_rs, fmap_gs = [], [], [], []
    for params, period in zip(all_params, PERIODS):
        y_d_r, fmap_r = discriminator_p_forward(params, y, period)
        y_d_g, fmap_g = discriminator_p_forward(params, y_hat, period)
        y_d_rs.append(y_d_r)
        fmap_rs.append(fmap_r)
        y_d_gs.append(y_d_g)
        fmap_gs.append(fmap_g)
    return y_d_rs, y_d_gs, fmap_rs, fmap_gs


# --------------------------- pure-JAX reference ------------------------------
# Mirrors the kernel's numerics: bf16 matmul operands, f32 accumulation,
# f32 bias + leaky-relu epilogue.

def ref_discriminator_p(params, x, period):
    B, C, T = x.shape
    if T % period != 0:
        n_pad = period - T % period
        x = jnp.pad(x, ((0, 0), (0, 0), (0, n_pad)), mode="reflect")
        T += n_pad
    x = x.reshape(B, C, T // period, period)
    for i, (w, b) in enumerate(params):
        _, _, _, stride, pad = LAYER_SPECS[i]
        w4 = jnp.transpose(w, (2, 1, 0))[..., None]   # (Cout, Cin, K, 1) OIHW
        x = lax.conv_general_dilated(
            x.astype(jnp.bfloat16), w4.astype(jnp.bfloat16),
            window_strides=(stride, 1),
            padding=[(pad, pad), (0, 0)],
            dimension_numbers=("NCHW", "OIHW", "NCHW"),
            preferred_element_type=jnp.float32)
        x = x + b.reshape(1, -1, 1, 1)
        if i < len(params) - 1:
            x = jnp.where(x >= 0, x, LRELU_SLOPE * x)
    return x.reshape(B, -1)


# ---------------------------------- main -------------------------------------

if __name__ == "__main__":
    key = jax.random.PRNGKey(0)
    kp, ky, kg = jax.random.split(key, 3)
    all_params = [init_disc_params(jax.random.fold_in(kp, i))
                  for i in range(len(PERIODS))]

    B, T = 2, 120
    y = jax.random.normal(ky, (B, 1, T), jnp.float32)
    y_hat = jax.random.normal(kg, (B, 1, T), jnp.float32)

    outs = multi_period_discriminator(all_params, y, y_hat)
    jax.block_until_ready(outs)
    y_d_rs, y_d_gs, fmap_rs, fmap_gs = outs

    # sanity check against a pure-JAX (XLA conv) reference with matching numerics
    for params, period, got_r, got_g in zip(all_params, PERIODS, y_d_rs, y_d_gs):
        ref_r = ref_discriminator_p(params, y, period)
        ref_g = ref_discriminator_p(params, y_hat, period)
        np.testing.assert_allclose(np.asarray(got_r), np.asarray(ref_r),
                                   rtol=2e-2, atol=2e-3)
        np.testing.assert_allclose(np.asarray(got_g), np.asarray(ref_g),
                                   rtol=2e-2, atol=2e-3)

    print("KERNEL_OK")
</pallas_src>

<mosaic_0001>
module attributes {stable_mosaic.version = 11 : i64} {
  func.func @kernel(%arg0: i32, %arg1: memref<80x5xbf16, #tpu.memory_space<vmem>>, %arg2: memref<5x128xbf16, #tpu.memory_space<vmem>>, %arg3: memref<1x128xf32, #tpu.memory_space<vmem>>, %arg4: memref<80x128xf32, #tpu.memory_space<vmem>>) attributes {dimension_semantics = [#tpu.dimension_semantics<parallel>], iteration_bounds = array<i64: 1>, scalar_prefetch = 0 : i64, scratch_operands = 0 : i64, tpu.core_type = #tpu.core_type<tc>, window_params = [{transform_indices = @transform_0, window_bounds = array<i64: 80, 5>}, {pipeline_mode = #tpu.pipeline_mode<synchronous>, transform_indices = @transform_1, window_bounds = array<i64: 5, 128>}, {pipeline_mode = #tpu.pipeline_mode<synchronous>, transform_indices = @transform_2, window_bounds = array<i64: 1, 128>}, {transform_indices = @transform_3, window_bounds = array<i64: 80, 128>}]} {
    %c0 = arith.constant 0 : index
    %c0_0 = arith.constant 0 : index
    %0 = vector.load %arg1[%c0, %c0_0] : memref<80x5xbf16, #tpu.memory_space<vmem>>, vector<80x5xbf16>
    %c0_1 = arith.constant 0 : index
    %c0_2 = arith.constant 0 : index
    %1 = vector.load %arg2[%c0_1, %c0_2] : memref<5x128xbf16, #tpu.memory_space<vmem>>, vector<5x128xbf16>
    %cst = arith.constant dense<0.000000e+00> : vector<80x128xf32>
    %2 = tpu.matmul %0, %1, %cst {dimension_numbers = #tpu.dot_dimension_numbers<[1], [0], [0], [1], [0, 0, 1, 1], [], []>} : vector<80x5xbf16>, vector<5x128xbf16>, vector<80x128xf32> -> vector<80x128xf32>
    %c0_3 = arith.constant 0 : index
    %c0_4 = arith.constant 0 : index
    %3 = vector.load %arg3[%c0_3, %c0_4] : memref<1x128xf32, #tpu.memory_space<vmem>>, vector<1x128xf32>
    %4 = vector.broadcast %3 : vector<1x128xf32> to vector<80x128xf32>
    %5 = arith.addf %2, %4 : vector<80x128xf32>
    %cst_5 = arith.constant 0.000000e+00 : f32
    %6 = vector.broadcast %cst_5 : f32 to vector<80x128xf32>
    %7 = arith.cmpf oge, %5, %6 : vector<80x128xf32>
    %cst_6 = arith.constant 1.000000e-01 : f32
    %8 = vector.broadcast %cst_6 : f32 to vector<80x128xf32>
    %9 = arith.mulf %8, %5 : vector<80x128xf32>
    %10 = arith.select %7, %5, %9 : vector<80x128xi1>, vector<80x128xf32>
    %c0_7 = arith.constant 0 : index
    %c0_8 = arith.constant 0 : index
    %11 = vector.load %arg4[%c0_7, %c0_8] : memref<80x128xf32, #tpu.memory_space<vmem>>, vector<80x128xf32>
    tpu.vector_store %arg4[%c0_7, %c0_8], %10 {strides = array<i32>} : memref<80x128xf32, #tpu.memory_space<vmem>>, vector<80x128xf32>,
    return
  }
  func.func @transform_0(%arg0: i32) -> (i32, i32) {
    %c0_i32 = arith.constant 0 : i32
    %c0_i32_0 = arith.constant 0 : i32
    return %arg0, %c0_i32 : i32, i32
  }
  func.func @transform_1(%arg0: i32) -> (i32, i32) {
    %c0_i32 = arith.constant 0 : i32
    %c0_i32_0 = arith.constant 0 : i32
    %c0_i32_1 = arith.constant 0 : i32
    return %c0_i32, %c0_i32_0 : i32, i32
  }
  func.func @transform_2(%arg0: i32) -> (i32, i32) {
    %c0_i32 = arith.constant 0 : i32
    %c0_i32_0 = arith.constant 0 : i32
    %c0_i32_1 = arith.constant 0 : i32
    return %c0_i32, %c0_i32_0 : i32, i32
  }
  func.func @transform_3(%arg0: i32) -> (i32, i32) {
    %c0_i32 = arith.constant 0 : i32
    %c0_i32_0 = arith.constant 0 : i32
    return %arg0, %c0_i32 : i32, i32
  }
}

</mosaic_0001>

<bundles_post_ra>
// kernel: tpu_custom_call.1
= control target key start
LH: loop header
LB: loop body
LE: loop exit
PB: predicated region body
PF: predicated region fallthrough
CT: control target
= control target key end

     0   :  { %vm72_vm0 = vcmask 1041408   ;;  %vm73_vm1 = vcmask 1042432   ;;  %v235_v1 = vmov 65535   ;;  %s283_s0 = inlined_call_operand.vmem [shape: bf16[80,5], index: 0, kind: input, shape index: {}]   ;;  %s284_s1 = inlined_call_operand.vmem [shape: bf16[5,128], index: 1, kind: input, shape index: {}]   ;;  %s285_s2 = inlined_call_operand.vmem [shape: f32[1,128], index: 2, kind: input, shape index: {}]   ;;  %s286_s3 = inlined_call_operand.hbm [shape: f32[80,128], index: 3, kind: output, shape index: {}]  }
   0x1   :  { %v26_v0 = vld [vmem:[%s284_s1] sm:$0x7]  ;;  %v74_v2 = vsel %vm72_vm0, 4294967295, %v235_v1 }
   0x2   :  { %v75_v3 = vsel %vm73_vm1, %v74_v2, 0 }
   0x3   :  { %v77_v4 = vand.u32 %v75_v3, %v26_v0 }
   0x4   :  { %8 = vsyncpa [#allocation3], 0  ;;  %v198_v5 = vld [vmem:[%s283_s0 + $0x10] sm:$0xff]  ;;  %v200_v6 = vld [vmem:[%s283_s0 + $0x20] sm:$0xff]  ;;  %vm56_vm2 = vcmask 39936   ;;  %s159_s27 = sshll.u32 %s286_s3, 4  ;;  %s160_s27 = int_to_ptr.hbm [resolvable:$true] %s159_s27 }
   0x5   :  { %202 = vmatpush.bf16.msra.mxu2 %v77_v4  ;;  %203 = vmatpush.bf16.msra.mxu3 %v77_v4  ;;  %v196_v7 = vld [vmem:[%s283_s0] sm:$0xff]  ;;  %v197_v8 = vld [vmem:[%s283_s0 + $0x8] sm:$0xff]  ;;  %v199_v9 = vld [vmem:[%s283_s0 + $0x18] sm:$0xff]  ;;  %s236_s0 = smov [#allocation2]   ;;  %s237_s28 = smov 128  }
   0x6   :  { %86 = vmatpush.bf16.msra.mxu0 %v77_v4  ;;  %201 = vmatpush.bf16.msra.mxu1 %v77_v4  ;;  %v208_v10 = vld [vmem:[%s285_s2] ss:$0 sm:$0xff]  ;;  %s157_s2 = sshll.u32 %s236_s0, 4  ;;  %s238_s29 = smov 8   ;;  %s158_s2 = int_to_ptr.vmem [resolvable:$true] %s157_s2 }
   0x8   :  { %193 = vmatmul.msk.bf16.vlgmr.msra.gmra.mxu2 %vm56_vm2, %v198_v5  ;;  %195 = vmatmul.msk.bf16.vlgmr.msra.gmra.mxu3 %vm56_vm2, %v200_v6 }
   0x9   :  { %191 = vmatmul.msk.bf16.vlgmr.msra.gmra.mxu0 %vm56_vm2, %v196_v7  ;;  %192 = vmatmul.msk.bf16.vlgmr.msra.gmra.mxu1 %vm56_vm2, %v197_v8 }
  0x18   :  { %194 = vmatmul.msk.bf16.gmra.mxu2 %vm56_vm2, %v199_v9 }
  0x86   :  { %v88_v11 = vpop.f32.mrf.mxu0  ;;  %v93_v12 = vpop.f32.mrf.mxu1 }
  0x87   :  { %v89_v13 = vadd.f32 %v208_v10, %v88_v11  ;;  %v94_v14 = vadd.f32 %v208_v10, %v93_v12 }
  0x89   :  { %vm113_vm3 = vcmp.ge.f32.partialorder %v89_v13, 0.0  ;;  %v123_v15 = vmul.f32 0.1, %v89_v13  ;;  %vm115_vm4 = vcmp.ge.f32.partialorder %v94_v14, 0.0  ;;  %v125_v16 = vmul.f32 0.1, %v94_v14 }
  0x8b   :  { %v98_v17 = vpop.f32.mrf.mxu2  ;;  %v133_v18 = vsel %vm113_vm3, %v89_v13, %v123_v15  ;;  %v135_v19 = vsel %vm115_vm4, %v94_v14, %v125_v16  ;;  %v108_v20 = vpop.f32.mrf.mxu3 }
  0x8c   :  { %v99_v21 = vadd.f32 %v208_v10, %v98_v17  ;;  %143 = vst [vmem:[#allocation2] sm:$0xff] %v133_v18  ;;  %v109_v22 = vadd.f32 %v208_v10, %v108_v20 }
  0x8d   :  { %145 = vst [vmem:[#allocation2 + $0x10] sm:$0xff] %v135_v19 }
  0x8e   :  { %vm117_vm5 = vcmp.ge.f32.partialorder %v99_v21, 0.0  ;;  %v127_v23 = vmul.f32 0.1, %v99_v21  ;;  %vm121_vm6 = vcmp.ge.f32.partialorder %v109_v22, 0.0  ;;  %v131_v24 = vmul.f32 0.1, %v109_v22  ;;  %v90_v25 = vpop.f32.mrf.mxu0  ;;  %v95_v26 = vpop.f32.mrf.mxu1 }
  0x8f   :  { %v91_v27 = vadd.f32 %v208_v10, %v90_v25  ;;  %v96_v28 = vadd.f32 %v208_v10, %v95_v26 }
  0x90   :  { %v137_v29 = vsel %vm117_vm5, %v99_v21, %v127_v23  ;;  %v141_v30 = vsel %vm121_vm6, %v109_v22, %v131_v24 }
  0x91   :  { %147 = vst [vmem:[#allocation2 + $0x20] sm:$0xff] %v137_v29  ;;  %vm114_vm7 = vcmp.ge.f32.partialorder %v91_v27, 0.0  ;;  %v124_v31 = vmul.f32 0.1, %v91_v27  ;;  %vm116_vm8 = vcmp.ge.f32.partialorder %v96_v28, 0.0 }
  0x92   :  { %151 = vst [vmem:[#allocation2 + $0x40] sm:$0xff] %v141_v30  ;;  %v126_v32 = vmul.f32 0.1, %v96_v28 }
  0x93   :  { %v100_v33 = vpop.f32.mrf.mxu2  ;;  %v134_v34 = vsel %vm114_vm7, %v91_v27, %v124_v31  ;;  %v110_v35 = vpop.f32.mrf.mxu3 }
  0x94   :  { %v101_v36 = vadd.f32 %v208_v10, %v100_v33  ;;  %144 = vst [vmem:[#allocation2 + $0x8] sm:$0xff] %v134_v34  ;;  %v136_v37 = vsel %vm116_vm8, %v96_v28, %v126_v32  ;;  %v111_v38 = vadd.f32 %v208_v10, %v110_v35 }
  0x95   :  { %146 = vst [vmem:[#allocation2 + $0x18] sm:$0xff] %v136_v37 }
  0x96   :  { %vm118_vm9 = vcmp.ge.f32.partialorder %v101_v36, 0.0  ;;  %v128_v39 = vmul.f32 0.1, %v101_v36  ;;  %vm122_vm10 = vcmp.ge.f32.partialorder %v111_v38, 0.0  ;;  %v132_v40 = vmul.f32 0.1, %v111_v38 }
  0x98   :  { %v138_v41 = vsel %vm118_vm9, %v101_v36, %v128_v39  ;;  %v142_v42 = vsel %vm122_vm10, %v111_v38, %v132_v40 }
  0x99   :  { %148 = vst [vmem:[#allocation2 + $0x28] sm:$0xff] %v138_v41 }
  0x9a   :  { %152 = vst [vmem:[#allocation2 + $0x48] sm:$0xff] %v142_v42 }
  0x9b   :  { %v103_v43 = vpop.f32.mrf.mxu2 }
  0x9c   :  { %v104_v44 = vadd.f32 %v208_v10, %v103_v43 }
  0x9e   :  { %vm119_vm11 = vcmp.ge.f32.partialorder %v104_v44, 0.0  ;;  %v129_v45 = vmul.f32 0.1, %v104_v44 }
  0xa0   :  { %v139_v46 = vsel %vm119_vm11, %v104_v44, %v129_v45 }
  0xa1   :  { %149 = vst [vmem:[#allocation2 + $0x30] sm:$0xff] %v139_v46 }
  0xa3   :  { %v105_v47 = vpop.f32.mrf.mxu2 }
  0xa4   :  { %v106_v48 = vadd.f32 %v208_v10, %v105_v47 }
  0xa6   :  { %vm120_vm12 = vcmp.ge.f32.partialorder %v106_v48, 0.0  ;;  %v130_v49 = vmul.f32 0.1, %v106_v48 }
  0xa8   :  { %v140_v50 = vsel %vm120_vm12, %v106_v48, %v130_v49 }
  0xa9   :  { %150 = vst [vmem:[#allocation2 + $0x38] sm:$0xff] %v140_v50 }
  0xaa   :  { %165 = dma.vmem_to_hbm [thread:$0]  %s158_s2, 1280, %s160_s27, [#allocation3], %s237_s28, %s237_s28, %s238_s29  }
  0xab   :  { %233 = dma.done.wait [#allocation3], 1280  }
  0xac   :  { %234 = vsyncadd [#allocation3], 4294966016 }
  0xad   :  { %170 = vsyncpa [#allocation3], 1 }

</bundles_post_ra>
